<compile_context>
chip_gen: v7x
topology: tpu7x:2x2x1
jax: 0.10.0
libtpu: 0.0.40
codegen_flags: <defaults>
</compile_context>

<pallas_src>
import jax
import jax.numpy as jnp
from jax.experimental import pallas as pl
from jax.experimental.pallas import tpu as pltpu


def _round_up(v, m):
    return (v + m - 1) // m * m


def _vmem_limit_bytes():
    """~3/4 of physical VMEM per TensorCore (48 MiB fallback, safe on v7x)."""
    try:
        cap = int(pltpu.get_tpu_info().vmem_capacity_bytes)
    except Exception:
        cap = 64 * 1024 * 1024
    return min((cap * 3) // 4, 100 * 1024 * 1024)


def _choose_row_tile(N, Dp, block_n, vmem_limit_bytes, io_bytes):
    """Pick the row tile from the VMEM budget (multiple of 128 when N allows)."""
    # Single-buffered bf16 weights + (1, Dp) f32 vectors + compiler headroom.
    fixed = 2 * Dp * Dp * 2 + 3 * Dp * 4 + (4 << 20)
    # Per row: double-buffered x + out tiles (io dtype) plus ~3 f32 and 2 bf16
    # live intermediates inside the kernel body.
    per_row = (2 + 2) * Dp * io_bytes + 3 * Dp * 4 + 2 * Dp * 2
    budget_rows = max((vmem_limit_bytes - fixed) // per_row, 8)
    if N <= 128:
        return _round_up(N, 8)
    bn = min(block_n, budget_rows)
    bn = max(128, (bn // 128) * 128)
    # Guarantee >= 2 grid steps so the "parallel" axis can use both v7x TCs.
    if _round_up(N, bn) // bn < 2:
        bn = max(128, _round_up((N + 1) // 2, 128))
    return bn


def _res_layer_kernel(x_ref, s1_ref, t1_ref, w1_ref, b1_ref, w2_ref, o_ref):
    # BatchNorm1d #1 (eval, folded) + LeakyReLU(0.1) -- f32 on the VPU.
    x = x_ref[...].astype(jnp.float32)               # (TN, Dp)
    h = x * s1_ref[...] + t1_ref[...]
    h = jnp.where(h > 0, h, 0.1 * h)

    # Dropout(p=0.3): identity in eval mode.
    # TODO(synk): training-mode dropout (stochastic mask via pltpu.prng_*) not emitted.

    # Linear #1 with BN2 pre-folded into weight/bias (bf16 operands, f32 MXU acc).
    h = jnp.dot(h.astype(w1_ref.dtype), w1_ref[...],
                preferred_element_type=jnp.float32) + b1_ref[...]

    # LeakyReLU(0.1) after the (folded) BN2.
    h = jnp.where(h > 0, h, 0.1 * h)

    # Linear #2 (no bias) on the MXU, f32 accumulate.
    h = jnp.dot(h.astype(w2_ref.dtype), w2_ref[...],
                preferred_element_type=jnp.float32)

    # Residual add: re-read x from VMEM (short live range across the matmuls).
    o_ref[...] = (x_ref[...].astype(jnp.float32) + h).astype(o_ref.dtype)


def prepare_params(params, *, mxu_dtype=jnp.bfloat16):
    """One-time fold / pad / cast of ResLayer parameters (hoisted off the hot path).

    Folds BN2 (eval affine) into Linear1:
      (h @ W1^T + b1) * s2 + t2 == h @ (W1^T * s2) + (b1 * s2 + t2)
    and pads the feature dim to a multiple of 128 (lane-dense, full MXU tiles).
    """
    D = params["w1_t"].shape[0]
    Dp = _round_up(D, 128)

    w1f = params["w1_t"] * params["s2"][None, :]
    b1f = params["b1"] * params["s2"] + params["t2"]

    def pad_vec(v):                                  # (D,) -> (1, Dp) f32
        return jnp.pad(v, (0, Dp - D)).reshape(1, Dp).astype(jnp.float32)

    return {
        "D": D,
        "Dp": Dp,
        "s1": pad_vec(params["s1"]),
        "t1": pad_vec(params["t1"]),
        "b1": pad_vec(b1f),
        "w1": jnp.pad(w1f, ((0, Dp - D), (0, Dp - D))).astype(mxu_dtype),
        "w2": jnp.pad(params["w2_t"], ((0, Dp - D), (0, Dp - D))).astype(mxu_dtype),
    }


def res_layer_pallas(x, prepped, *, block_n=1024, io_dtype=jnp.float32,
                     donate_padded_x=False):
    """x: (N, D) float32. prepped: output of prepare_params()."""
    N, D = x.shape
    assert D == prepped["D"], "feature dim mismatch vs prepared params"
    Dp = prepped["Dp"]

    io_dtype = jnp.dtype(io_dtype)
    vmem_limit = _vmem_limit_bytes()
    bn = _choose_row_tile(N, Dp, block_n, vmem_limit, io_dtype.itemsize)
    Np = _round_up(N, bn)

    xp = x.astype(io_dtype)
    if (Np, Dp) != (N, D):
        xp = jnp.pad(xp, ((0, Np - N), (0, Dp - D)))

    # Grid-invariant operands: constant index_map + single buffer (saves VMEM,
    # no per-step re-fetch).
    vec_spec = pl.BlockSpec((1, Dp), lambda i: (0, 0), pipeline_mode=pl.Buffered(1))
    mat_spec = pl.BlockSpec((Dp, Dp), lambda i: (0, 0), pipeline_mode=pl.Buffered(1))

    out = pl.pallas_call(
        _res_layer_kernel,
        out_shape=jax.ShapeDtypeStruct((Np, Dp), io_dtype),
        grid_spec=pltpu.PrefetchScalarGridSpec(
            num_scalar_prefetch=0,
            grid=(Np // bn,),
            in_specs=[
                pl.BlockSpec((bn, Dp), lambda i: (i, 0)),   # x row tile
                vec_spec, vec_spec,                          # BN1 scale/shift
                mat_spec, vec_spec,                          # W1' (bf16), b1'
                mat_spec,                                    # W2  (bf16)
            ],
            out_specs=pl.BlockSpec((bn, Dp), lambda i: (i, 0)),
        ),
        compiler_params=pltpu.CompilerParams(
            dimension_semantics=("parallel",),
            vmem_limit_bytes=vmem_limit,
        ),
        input_output_aliases=({0: 0} if donate_padded_x else {}),
    )(xp, prepped["s1"], prepped["t1"], prepped["w1"], prepped["b1"], prepped["w2"])

    if (Np, Dp) != (N, D):
        out = out[:N, :D]
    return out.astype(x.dtype)


def make_params(key, dim, eps=0.01):
    """Deterministic synthetic parameters matching ResLayer(dim).__init__ shapes."""
    ks = jax.random.split(key, 10)
    # BatchNorm1d #1 (eps=0.01, as in the module)
    g1 = jax.random.normal(ks[0], (dim,), jnp.float32) * 0.1 + 1.0
    be1 = jax.random.normal(ks[1], (dim,), jnp.float32) * 0.1
    rm1 = jax.random.normal(ks[2], (dim,), jnp.float32) * 0.1
    rv1 = jnp.abs(jax.random.normal(ks[3], (dim,), jnp.float32)) * 0.1 + 1.0
    # Linear #1: weight (out, in), bias (out,)
    w1 = jax.random.normal(ks[4], (dim, dim), jnp.float32) * (1.0 / jnp.sqrt(dim))
    b1 = jax.random.normal(ks[5], (dim,), jnp.float32) * 0.1
    # BatchNorm1d #2
    g2 = jax.random.normal(ks[6], (dim,), jnp.float32) * 0.1 + 1.0
    be2 = jax.random.normal(ks[7], (dim,), jnp.float32) * 0.1
    rm2 = jax.random.normal(ks[8], (dim,), jnp.float32) * 0.1
    rv2 = jnp.abs(jax.random.normal(ks[9], (dim,), jnp.float32)) * 0.1 + 1.0
    # Linear #2 (no bias): weight (out, in)
    w2 = jax.random.normal(jax.random.fold_in(key, 99), (dim, dim),
                           jnp.float32) * (1.0 / jnp.sqrt(dim))

    # Fold BN (eval mode) into scale/shift:  y = x*s + t
    s1 = g1 / jnp.sqrt(rv1 + eps)
    t1 = be1 - rm1 * s1
    s2 = g2 / jnp.sqrt(rv2 + eps)
    t2 = be2 - rm2 * s2

    return {
        "s1": s1, "t1": t1,
        "w1_t": w1.T, "b1": b1,   # pre-transposed for x @ W
        "s2": s2, "t2": t2,
        "w2_t": w2.T,
    }


def res_layer_ref(x, p):
    """Plain-JAX f32 reference (eval-mode PyTorch semantics)."""
    h = x * p["s1"] + p["t1"]
    h = jnp.where(h > 0, h, 0.1 * h)
    h = h @ p["w1_t"] + p["b1"]
    h = h * p["s2"] + p["t2"]
    h = jnp.where(h > 0, h, 0.1 * h)
    h = h @ p["w2_t"]
    return x + h


if __name__ == "__main__":
    key = jax.random.PRNGKey(0)

    # Case 1: lane-dense D with a multi-step, megacore-shardable grid
    # (row-tile selection forces >= 2 grid steps here).
    N, D = 256, 128
    x = jax.random.normal(jax.random.fold_in(key, 1), (N, D), jnp.float32)
    params = make_params(jax.random.fold_in(key, 2), D)
    prepped = prepare_params(params)          # one-time fold / pad / bf16 cast
    out = jax.block_until_ready(res_layer_pallas(x, prepped))
    ref = res_layer_ref(x, params)
    assert out.shape == (N, D)
    # bf16 matmul operands (f32 accumulate) vs. f32 reference -> modest tolerance.
    assert jnp.allclose(out, ref, atol=5e-2, rtol=5e-2), "mismatch vs reference (case 1)"

    # Case 2: small, non-aligned shapes exercising the pad-to-(8,128)/slice path.
    N2, D2 = 8, 32
    x2 = jax.random.normal(jax.random.fold_in(key, 3), (N2, D2), jnp.float32)
    params2 = make_params(jax.random.fold_in(key, 4), D2)
    prepped2 = prepare_params(params2)
    out2 = jax.block_until_ready(res_layer_pallas(x2, prepped2))
    ref2 = res_layer_ref(x2, params2)
    assert out2.shape == (N2, D2)
    assert jnp.allclose(out2, ref2, atol=5e-2, rtol=5e-2), "mismatch vs reference (case 2)"

    print("KERNEL_OK")
</pallas_src>

<mosaic_0001>
module attributes {stable_mosaic.version = 11 : i64} {
  func.func @_res_layer_kernel(%arg0: i32, %arg1: memref<128x128xf32, #tpu.memory_space<vmem>>, %arg2: memref<1x128xf32, #tpu.memory_space<vmem>>, %arg3: memref<1x128xf32, #tpu.memory_space<vmem>>, %arg4: memref<128x128xbf16, #tpu.memory_space<vmem>>, %arg5: memref<1x128xf32, #tpu.memory_space<vmem>>, %arg6: memref<128x128xbf16, #tpu.memory_space<vmem>>, %arg7: memref<128x128xf32, #tpu.memory_space<vmem>>) attributes {dimension_semantics = [#tpu.dimension_semantics<parallel>], iteration_bounds = array<i64: 2>, scalar_prefetch = 0 : i64, scratch_operands = 0 : i64, tpu.core_type = #tpu.core_type<tc>, window_params = [{transform_indices = @transform_0, window_bounds = array<i64: 128, 128>}, {pipeline_mode = #tpu.pipeline_mode<synchronous>, transform_indices = @transform_1, window_bounds = array<i64: 1, 128>}, {pipeline_mode = #tpu.pipeline_mode<synchronous>, transform_indices = @transform_2, window_bounds = array<i64: 1, 128>}, {pipeline_mode = #tpu.pipeline_mode<synchronous>, transform_indices = @transform_3, window_bounds = array<i64: 128, 128>}, {pipeline_mode = #tpu.pipeline_mode<synchronous>, transform_indices = @transform_4, window_bounds = array<i64: 1, 128>}, {pipeline_mode = #tpu.pipeline_mode<synchronous>, transform_indices = @transform_5, window_bounds = array<i64: 128, 128>}, {transform_indices = @transform_6, window_bounds = array<i64: 128, 128>}]} {
    %c0 = arith.constant 0 : index
    %c0_0 = arith.constant 0 : index
    %0 = vector.load %arg1[%c0, %c0_0] : memref<128x128xf32, #tpu.memory_space<vmem>>, vector<128x128xf32>
    %c0_1 = arith.constant 0 : index
    %c0_2 = arith.constant 0 : index
    %1 = vector.load %arg2[%c0_1, %c0_2] : memref<1x128xf32, #tpu.memory_space<vmem>>, vector<1x128xf32>
    %2 = vector.broadcast %1 : vector<1x128xf32> to vector<128x128xf32>
    %3 = arith.mulf %0, %2 : vector<128x128xf32>
    %c0_3 = arith.constant 0 : index
    %c0_4 = arith.constant 0 : index
    %4 = vector.load %arg3[%c0_3, %c0_4] : memref<1x128xf32, #tpu.memory_space<vmem>>, vector<1x128xf32>
    %5 = vector.broadcast %4 : vector<1x128xf32> to vector<128x128xf32>
    %6 = arith.addf %3, %5 : vector<128x128xf32>
    %cst = arith.constant 0.000000e+00 : f32
    %7 = vector.broadcast %cst : f32 to vector<128x128xf32>
    %8 = arith.cmpf ogt, %6, %7 : vector<128x128xf32>
    %cst_5 = arith.constant 1.000000e-01 : f32
    %9 = vector.broadcast %cst_5 : f32 to vector<128x128xf32>
    %10 = arith.mulf %9, %6 : vector<128x128xf32>
    %11 = arith.select %8, %6, %10 : vector<128x128xi1>, vector<128x128xf32>
    %12 = arith.truncf %11 : vector<128x128xf32> to vector<128x128xbf16>
    %c0_6 = arith.constant 0 : index
    %c0_7 = arith.constant 0 : index
    %13 = vector.load %arg4[%c0_6, %c0_7] : memref<128x128xbf16, #tpu.memory_space<vmem>>, vector<128x128xbf16>
    %cst_8 = arith.constant dense<0.000000e+00> : vector<128x128xf32>
    %14 = tpu.matmul %12, %13, %cst_8 {dimension_numbers = #tpu.dot_dimension_numbers<[1], [0], [0], [1], [0, 0, 1, 1], [], []>} : vector<128x128xbf16>, vector<128x128xbf16>, vector<128x128xf32> -> vector<128x128xf32>
    %c0_9 = arith.constant 0 : index
    %c0_10 = arith.constant 0 : index
    %15 = vector.load %arg5[%c0_9, %c0_10] : memref<1x128xf32, #tpu.memory_space<vmem>>, vector<1x128xf32>
    %16 = vector.broadcast %15 : vector<1x128xf32> to vector<128x128xf32>
    %17 = arith.addf %14, %16 : vector<128x128xf32>
    %cst_11 = arith.constant 0.000000e+00 : f32
    %18 = vector.broadcast %cst_11 : f32 to vector<128x128xf32>
    %19 = arith.cmpf ogt, %17, %18 : vector<128x128xf32>
    %cst_12 = arith.constant 1.000000e-01 : f32
    %20 = vector.broadcast %cst_12 : f32 to vector<128x128xf32>
    %21 = arith.mulf %20, %17 : vector<128x128xf32>
    %22 = arith.select %19, %17, %21 : vector<128x128xi1>, vector<128x128xf32>
    %23 = arith.truncf %22 : vector<128x128xf32> to vector<128x128xbf16>
    %c0_13 = arith.constant 0 : index
    %c0_14 = arith.constant 0 : index
    %24 = vector.load %arg6[%c0_13, %c0_14] : memref<128x128xbf16, #tpu.memory_space<vmem>>, vector<128x128xbf16>
    %cst_15 = arith.constant dense<0.000000e+00> : vector<128x128xf32>
    %25 = tpu.matmul %23, %24, %cst_15 {dimension_numbers = #tpu.dot_dimension_numbers<[1], [0], [0], [1], [0, 0, 1, 1], [], []>} : vector<128x128xbf16>, vector<128x128xbf16>, vector<128x128xf32> -> vector<128x128xf32>
    %c0_16 = arith.constant 0 : index
    %c0_17 = arith.constant 0 : index
    %26 = vector.load %arg1[%c0_16, %c0_17] : memref<128x128xf32, #tpu.memory_space<vmem>>, vector<128x128xf32>
    %27 = arith.addf %26, %25 : vector<128x128xf32>
    %c0_18 = arith.constant 0 : index
    %c0_19 = arith.constant 0 : index
    %28 = vector.load %arg7[%c0_18, %c0_19] : memref<128x128xf32, #tpu.memory_space<vmem>>, vector<128x128xf32>
    tpu.vector_store %arg7[%c0_18, %c0_19], %27 {strides = array<i32>} : memref<128x128xf32, #tpu.memory_space<vmem>>, vector<128x128xf32>,
    return
  }
  func.func @transform_0(%arg0: i32) -> (i32, i32) {
    %c0_i32 = arith.constant 0 : i32
    %c0_i32_0 = arith.constant 0 : i32
    return %arg0, %c0_i32 : i32, i32
  }
  func.func @transform_1(%arg0: i32) -> (i32, i32) {
    %c0_i32 = arith.constant 0 : i32
    %c0_i32_0 = arith.constant 0 : i32
    %c0_i32_1 = arith.constant 0 : i32
    return %c0_i32, %c0_i32_0 : i32, i32
  }
  func.func @transform_2(%arg0: i32) -> (i32, i32) {
    %c0_i32 = arith.constant 0 : i32
    %c0_i32_0 = arith.constant 0 : i32
    %c0_i32_1 = arith.constant 0 : i32
    return %c0_i32, %c0_i32_0 : i32, i32
  }
  func.func @transform_3(%arg0: i32) -> (i32, i32) {
    %c0_i32 = arith.constant 0 : i32
    %c0_i32_0 = arith.constant 0 : i32
    %c0_i32_1 = arith.constant 0 : i32
    return %c0_i32, %c0_i32_0 : i32, i32
  }
  func.func @transform_4(%arg0: i32) -> (i32, i32) {
    %c0_i32 = arith.constant 0 : i32
    %c0_i32_0 = arith.constant 0 : i32
    %c0_i32_1 = arith.constant 0 : i32
    return %c0_i32, %c0_i32_0 : i32, i32
  }
  func.func @transform_5(%arg0: i32) -> (i32, i32) {
    %c0_i32 = arith.constant 0 : i32
    %c0_i32_0 = arith.constant 0 : i32
    %c0_i32_1 = arith.constant 0 : i32
    return %c0_i32, %c0_i32_0 : i32, i32
  }
  func.func @transform_6(%arg0: i32) -> (i32, i32) {
    %c0_i32 = arith.constant 0 : i32
    %c0_i32_0 = arith.constant 0 : i32
    return %arg0, %c0_i32 : i32, i32
  }
}

</mosaic_0001>

<bundles_post_ra>
// kernel: tpu_custom_call.1
= control target key start
LH: loop header
LB: loop body
LE: loop exit
PB: predicated region body
PF: predicated region fallthrough
CT: control target
= control target key end

     0   :  { %11 = vsyncpa [#allocation3], 0  ;;  %s1776_s0 = inlined_call_operand.hbm [shape: f32[256,128], index: 0, kind: input, shape index: {}]   ;;  %s1777_s1 = inlined_call_operand.vmem [shape: f32[1,128], index: 1, kind: input, shape index: {}]   ;;  %s1778_s2 = inlined_call_operand.vmem [shape: f32[1,128], index: 2, kind: input, shape index: {}]   ;;  %s1779_s3 = inlined_call_operand.hbm [shape: bf16[128,128], index: 3, kind: input, shape index: {}]   ;;  %s1780_s4 = inlined_call_operand.vmem [shape: f32[1,128], index: 4, kind: input, shape index: {}]   ;;  %s1781_s5 = inlined_call_operand.hbm [shape: bf16[128,128], index: 5, kind: input, shape index: {}]   ;;  %s1782_s6 = inlined_call_operand.hbm [shape: f32[256,128], index: 6, kind: output, shape index: {}]  }
   0x1   :  { %13 = vsyncpa [#allocation3 + $0x1], 0 }
   0x2   :  { %14 = vsyncpa [#allocation6], 0 }
   0x3   :  { %15 = vsyncpa [#allocation4], 0 }
   0x4   :  { %17 = vsyncpa [#allocation4 + $0x1], 0  ;;  %s1370_s21 = smov 0   ;;  %s1372_s22 = smov 0  }
   0x5   :  { %s1374_s23 = smov 0   ;;  %s1376_s24 = smov 0  }
   0x6 LB: > { %s1391_s25 = sadd.s32 4294967295, %s1323_s24   ;;  %s943_s26 = sadd.s32 4294967294, %s1323_s24   ;;  %s1323_s24 = sphi %s1376_s24, %s1802_s24   ;;  %s1319_s23 = sphi %s1374_s23, %s1801_s23   ;;  %s1315_s22 = sphi %s1372_s22, %s1800_s22   ;;  %s1311_s21 = sphi %s1370_s21, %s1799_s21  }
   0x7   : > { %p43_p0 = scmp.ne.s32.totalorder %s1315_s22, %s1311_s21  ;;  %p1783_p1 = scmp.eq.s32.totalorder %s1391_s25, 0 }
   0x8   : > { %p178_p3 = scmp.eq.s32.totalorder %s943_s26, 1  ;;  %p944_p5 = scmp.ge.s32.totalorder %s1323_s24, 1 }
   0x9   : > { %p1400_p4 = por %p1783_p1, %p43_p0  ;;  %p185_p7 = scmp.lt.s32.totalorder %s1323_s24, 3 }
   0xa   : > { %p1405_p6 = por %p178_p3, %p43_p0  ;;  %s1325_s30 = smov [#allocation5]  }
   0xb   : > { %s1786_s27 = scalar_select %p1400_p4, 1, 0 }
   0xc   : > { %s1787_s28 = scalar_select %p1405_p6, 1, 0 }
   0xd   : > { %p1410_p8 = pnand %p944_p5, %p185_p7  ;;  %s203_s7 = sshll.u32 %s1325_s30, 4  ;;  %s1414_s7 = int_to_ptr.vmem [resolvable:$true] %s203_s7 }
   0xe   : > { %s1326_s9 = smov [#allocation7]   ;;  %s1167_s13 = scalar_lea.hbm %s1779_s3, 1024 }
   0xf   : > { %p1090_p9 = pneg %p1410_p8  ;;  %s219_s10 = sshll.u32 %s1326_s9, 4  ;;  %s1425_s10 = int_to_ptr.vmem [resolvable:$true] %s219_s10 }
  0x10   : > { %p1168_p12 = scmp.ne.s32.totalorder %s1779_s3, %s1167_s13  ;;  %p1174_p5 = scmp.lt.u32.totalorder %s1167_s13, %s1779_s3 }
  0x11   : > { %p1421_p11 = pnand %p1090_p9, %p1783_p1 }
  0x13   : > { %p1169_p13 = pneg %p1421_p11 }
  0x15   : > { %p1170_p0 = pnand %p1169_p13, %p1168_p12 }
  0x17   : > { %p1171_p3 = pneg %p1170_p0 }
  0x19   : > { %p1176_p7 = pnand %p1174_p5, %p1171_p3 }
  0x1b   : > { %1179 = shalt.err (!%p1176_p7)
}
  0x1c   : > { %s1180_s18 = scalar_lea.vmem %s1414_s7, 1024  ;;  %p1188_p2 = scmp.lt.s32.totalorder %s1414_s7, %s1414_s7 }
  0x1d   : > { %p1181_p9 = scmp.ne.s32.totalorder %s1414_s7, %s1180_s18  ;;  %p1189_p12 = scmp.lt.s32.totalorder %s1180_s18, %s1180_s18 }
  0x1f   : > { %p1183_p10 = pnand %p1181_p9, %p1169_p13  ;;  %p1190_p0 = por %p1189_p12, %p1188_p2 }
  0x21   : > { %p1184_p1 = pneg %p1183_p10 }
  0x23   : > { %p1191_p6 = pnand %p1190_p0, %p1184_p1 }
  0x25   : > { %1194 = shalt.err (!%p1191_p6)
}
  0x26   : > { %s1327_s19 = smov 64   ;;  %s1328_s20 = smov 4  }
  0x27   : > { %1093 = dma.hbm_to_vmem [thread:$0]  (!%p1421_p11), %s1779_s3, 1024, %s1414_s7, [#allocation6], %s1327_s19, %s1327_s19, %s1328_s20  }
  0x28   : > { %s1195_s12 = scalar_lea.hbm %s1781_s5, 1024 }
  0x29   : > { %p1196_p2 = scmp.ne.s32.totalorder %s1781_s5, %s1195_s12  ;;  %p1202_p10 = scmp.lt.u32.totalorder %s1195_s12, %s1781_s5 }
  0x2b   : > { %p1198_p1 = pnand %p1196_p2, %p1169_p13 }
  0x2d   : > { %p1199_p6 = pneg %p1198_p1 }
  0x2f   : > { %p1204_p3 = pnand %p1202_p10, %p1199_p6 }
  0x31   : > { %1207 = shalt.err (!%p1204_p3)
}
  0x32   : > { %s1208_s7 = scalar_lea.vmem %s1425_s10, 1024  ;;  %p1216_p12 = scmp.lt.s32.totalorder %s1425_s10, %s1425_s10 }
  0x33   : > { %p1209_p5 = scmp.ne.s32.totalorder %s1425_s10, %s1208_s7  ;;  %p1217_p0 = scmp.lt.s32.totalorder %s1208_s7, %s1208_s7 }
  0x35   : > { %p1211_p7 = pnand %p1209_p5, %p1169_p13  ;;  %p1218_p2 = por %p1217_p0, %p1216_p12 }
  0x37   : > { %p1212_p9 = pneg %p1211_p7 }
  0x39   : > { %p1219_p1 = pnand %p1218_p2, %p1212_p9 }
  0x3b   : > { %1222 = shalt.err (!%p1219_p1)
}
  0x3c   : > { %1096 = dma.hbm_to_vmem [thread:$0]  (!%p1421_p11), %s1781_s5, 1024, %s1425_s10, [#allocation6], %s1327_s19, %s1327_s19, %s1328_s20  }
  0x3d   : > { %s1480_s26 = sadd.s32 1, %s1323_s24   ;;  %s30_s8 = sadd.s32 1, %s1319_s23 }
  0x3e   : > { %s27_s30 = ssub.s32 %s1323_s24, %s1480_s26  ;;  %p37_p13 = scmp.ne.s32.totalorder %s1319_s23, %s1315_s22 }
  0x3f   : > { %p28_p6 = scmp.eq.s32.totalorder %s27_s30, 0  ;;  %p38_p10 = scmp.eq.s32.totalorder %s1323_s24, 0 }
  0x40   : > { %p1790_p3 = scmp.eq.s32.totalorder %s1391_s25, 1  ;;  %p1107_p7 = scmp.lt.s32.totalorder %s1323_s24, 2 }
  0x41   : > { %s1496_s11 = scalar_select %p28_p6, %s1319_s23, %s30_s8  }
  0x42   : > { %p1490_p5 = por %p1790_p3, %p37_p13  ;;  %p39_p9 = por %p38_p10, %p37_p13 }
  0x43   : > { %s233_s12 = sand.u32 1, %s1319_s23   ;;  %s980_s10 = sshll.u32 %s1323_s24, 11 }
  0x44   : > { %s1791_s9 = scalar_select %p1490_p5, 1, 0 }
  0x45   : > { %s948_s13 = sshll.u32 %s233_s12, 7  ;;  %s1503_s14 = scalar_lea.hbm %s1776_s0, %s980_s10 }
  0x46   : > { %s237_s15 = scalar_lea.vmem [#allocation2], %s948_s13  ;;  %p1507_p11 = pnand %p1107_p7, %p39_p9 }
  0x47   : > { %s244_s16 = sshll.u32 %s237_s15, 4  ;;  %s1511_s17 = scalar_lea.sflag [#allocation3], %s233_s12  ;;  %s1505_s16 = int_to_ptr.vmem [resolvable:$true] %s244_s16 }
  0x48   : > { %s1223_s18 = scalar_lea.hbm %s1503_s14, 2048  ;;  %p1225_p0 = pneg %p1507_p11 }
  0x49   : > { %p1224_p12 = scmp.ne.s32.totalorder %s1503_s14, %s1223_s18  ;;  %s1228_s13 = scalar_lea.hbm %s1776_s0, 4096 }
  0x4a   : > { %p1229_p13 = scmp.lt.u32.totalorder %s1503_s14, %s1776_s0  ;;  %p1230_p6 = scmp.lt.u32.totalorder %s1228_s13, %s1223_s18 }
  0x4b   : > { %p1226_p2 = pnand %p1225_p0, %p1224_p12  ;;  %p1232_p3 = scmp.lt.u32.totalorder %s1223_s18, %s1503_s14 }
  0x4c   : > { %p1231_p10 = por %p1230_p6, %p1229_p13 }
  0x4d   : > { %p1227_p1 = pneg %p1226_p2 }
  0x4e   : > { %p1233_p7 = por %p1232_p3, %p1231_p10 }
  0x50   : > { %p1234_p9 = pnand %p1233_p7, %p1227_p1 }
  0x52   : > { %1237 = shalt.err (!%p1234_p9)
}
  0x53   : > { %s1238_s12 = scalar_lea.vmem %s1505_s16, 2048  ;;  %s1329_s20 = smov [#allocation2]  }
  0x54   : > { %p1239_p12 = scmp.ne.s32.totalorder %s1505_s16, %s1238_s12  ;;  %s1243_s15 = sshll.u32 %s1329_s20, 4  ;;  %s1244_s15 = int_to_ptr.vmem [resolvable:$false] %s1243_s15 }
  0x55   : > { %s1245_s8 = scalar_lea.vmem %s1244_s15, 4096  ;;  %p1246_p4 = scmp.lt.s32.totalorder %s1505_s16, %s1244_s15 }
  0x56   : > { %p1241_p2 = pnand %p1239_p12, %p1225_p0  ;;  %p1247_p13 = scmp.lt.s32.totalorder %s1245_s8, %s1238_s12 }
  0x58   : > { %p1242_p5 = pneg %p1241_p2  ;;  %p1248_p6 = por %p1247_p13, %p1246_p4 }
  0x5a   : > { %p1249_p10 = pnand %p1248_p6, %p1242_p5 }
  0x5c   : > { %1252 = shalt.err (!%p1249_p10)
}
  0x5d   : > { %s1330_s18 = smov 128   ;;  %s1331_s30 = smov 8  }
  0x5e   : > { %1100 = dma.hbm_to_vmem [thread:$0]  (!%p1507_p11), %s1503_s14, 2048, %s1505_s16, %s1511_s17, %s1330_s18, %s1330_s18, %s1331_s30  }
  0x5f   : > { %256 = sbr.rel (%p1410_p8) target bundleno = 618 (0x26a), region = 44  ;;  %s1542_s13 = sand.u32 (!%p1410_p8), 1, %s1315_s22  }
  0x60   : > { %s952_s10 = sshll.u32 (!%p1410_p8), %s1542_s13, 7  ;;  %s259_s19 = scalar_lea.sflag (!%p1410_p8), [#allocation3], %s1542_s13 }
  0x61   : > { %s1548_s12 = scalar_lea.vmem (!%p1410_p8), [#allocation2], %s952_s10  ;;  %p1793_p4 = scmp.ne.s32.totalorder (!%p1410_p8), %s1786_s27, 0 }
  0x66   : > { %1298 = dma.done.wait (%p1793_p4), %s259_s19, 2048  }
  0x67   : > { %1300 = vsyncadd (%p1793_p4), %s259_s19, 4294965248  ;;  %p1794_p5 = scmp.eq.s32.totalorder %s1391_s25, 0 }
  0x69   : > { %1302 = dma.done.wait (%p1794_p5), [#allocation6], 2048   ;;  %p1795_p8 = pmov %p1794_p5 }
  0x6a   : > { %v1151_v0 = vld [vmem:[#allocation5] sm:$0xff]   ;;  %v1152_v1 = vld [vmem:[#allocation5 + $0x8] sm:$0xff]   ;;  %v1153_v2 = vld [vmem:[#allocation5 + $0x10] sm:$0xff]   ;;  %s1693_s20 = scalar_lea.vmem [#allocation8], %s952_s10  ;;  %s981_s15 = sshll.u32 %s1391_s25, 11 }
  0x6b   : > { %1304 = vsyncadd (%p1795_p8), [#allocation6], 4294965248  ;;  %1014 = vmatprep.subr.bf16.mxu0 %v1151_v0  ;;  %v1154_v3 = vld [vmem:[#allocation5 + $0x18] sm:$0xff]   ;;  %v1559_v4 = vld [vmem:[%s1548_s12] sm:$0xff]  ;;  %s851_s8 = sshll.u32 %s1693_s20, 4  ;;  %s1726_s10 = scalar_lea.hbm %s1782_s6, %s981_s15  ;;  %s1728_s8 = int_to_ptr.vmem [resolvable:$true] %s851_s8 }
  0x6c   : > { %1015 = vmatpush3.bf16.msra.mxu0 %v1151_v0  ;;  %v1562_v5 = vld [vmem:[%s1548_s12 + $0x8] sm:$0xff]  ;;  %v1567_v6 = vld [vmem:[%s1777_s1] ss:$0 sm:$0xff]  ;;  %v1579_v10 = vld [vmem:[%s1548_s12 + $0x10] sm:$0xff]  ;;  %s838_s25 = scalar_lea.sflag [#allocation4], %s1542_s13  ;;  %s1253_s19 = scalar_lea.vmem %s1728_s8, 2048 }
  0x6d   : > { %1016 = vmatprep.subr.bf16.mxu0 %v1152_v1  ;;  %v325_v7 = vmul.f32 %v1567_v6, %v1559_v4  ;;  %v326_v8 = vmul.f32 %v1567_v6, %v1562_v5  ;;  %v1576_v9 = vld [vmem:[%s1778_s2] ss:$0 sm:$0xff]  ;;  %v1584_v13 = vld [vmem:[%s1548_s12 + $0x18] sm:$0xff]  ;;  %v327_v15 = vmul.f32 %v1567_v6, %v1579_v10  ;;  %v1592_v17 = vld [vmem:[%s1548_s12 + $0x28] sm:$0xff]  ;;  %p1254_p11 = scmp.ne.s32.totalorder %s1728_s8, %s1253_s19  ;;  %p1796_p0 = scmp.ne.s32.totalorder %s1791_s9, 0 }
  0x6e   : > { %v1155_v14 = vld [vmem:[#allocation5 + $0x20] sm:$0xff]   ;;  %v328_v20 = vmul.f32 %v1567_v6, %v1584_v13  ;;  %v1156_v21 = vld [vmem:[#allocation5 + $0x28] sm:$0xff]   ;;  %v330_v27 = vmul.f32 %v1567_v6, %v1592_v17  ;;  %v1157_v29 = vld [vmem:[#allocation5 + $0x30] sm:$0xff]  }
  0x6f   : > { %v348_v11 = vadd.f32 %v1576_v9, %v325_v7  ;;  %v349_v12 = vadd.f32 %v1576_v9, %v326_v8  ;;  %v1589_v16 = vld [vmem:[%s1548_s12 + $0x20] sm:$0xff]  ;;  %v350_v26 = vadd.f32 %v1576_v9, %v327_v15  ;;  %v1603_v31 = vld [vmem:[%s1548_s12 + $0x30] sm:$0xff]  ;;  %v1606_v32 = vld [vmem:[%s1548_s12 + $0x38] sm:$0xff]  ;;  %p1255_p1 = pnand %p1254_p11, %p1796_p0 }
  0x70   : > { %1017 = vmatpush3.bf16.msra.mxu0 %v1152_v1  ;;  %v329_v24 = vmul.f32 %v1567_v6, %v1589_v16  ;;  %v1159_v28 = vld [vmem:[#allocation7] sm:$0xff]   ;;  %v351_v30 = vadd.f32 %v1576_v9, %v328_v20  ;;  %v1160_v33 = vld [vmem:[#allocation7 + $0x8] sm:$0xff]   ;;  %v353_v36 = vadd.f32 %v1576_v9, %v330_v27  ;;  %v1161_v39 = vld [vmem:[#allocation7 + $0x10] sm:$0xff]   ;;  %v331_v41 = vmul.f32 %v1567_v6, %v1603_v31 }
  0x71   : > { %1018 = vmatprep.subr.bf16.mxu0 %v1153_v2  ;;  %vm364_vm0 = vcmp.gt.f32.partialorder %v348_v11, 0.0  ;;  %vm365_vm1 = vcmp.gt.f32.partialorder %v349_v12, 0.0  ;;  %v380_v18 = vmul.f32 0.1, %v348_v11  ;;  %v381_v19 = vmul.f32 0.1, %v349_v12  ;;  %1046 = vmatprep.subr.bf16.mxu1 %v1159_v28  ;;  %p1256_p3 = pneg %p1255_p1 }
  0x72   : > { %v352_v34 = vadd.f32 %v1576_v9, %v329_v24  ;;  %v382_v35 = vmul.f32 0.1, %v350_v26  ;;  %v1611_v37 = vld [vmem:[%s1548_s12 + $0x40] sm:$0xff]  ;;  %v1614_v38 = vld [vmem:[%s1548_s12 + $0x48] sm:$0xff]  ;;  %1047 = vmatpush3.bf16.msra.mxu1 %v1159_v28  ;;  %vm366_vm2 = vcmp.gt.f32.partialorder %v350_v26, 0.0  ;;  %vm367_vm3 = vcmp.gt.f32.partialorder %v351_v30, 0.0 }
  0x73   : > { %v396_v22 = vsel %vm364_vm0, %v348_v11, %v380_v18  ;;  %v397_v23 = vsel %vm365_vm1, %v349_v12, %v381_v19  ;;  %1048 = vmatprep.subr.bf16.mxu1 %v1160_v33  ;;  %v383_v40 = vmul.f32 0.1, %v351_v30  ;;  %v332_v43 = vmul.f32 %v1567_v6, %v1606_v32  ;;  %v1158_v44 = vld [vmem:[#allocation5 + $0x38] sm:$0xff]   ;;  %v1630_v54 = vld [vmem:[%s1548_s12 + $0x50] sm:$0xff]  ;;  %v1638_v59 = vld [vmem:[%s1548_s12 + $0x60] sm:$0xff] }
  0x74   : > { %1019 = vmatpush3.bf16.msra.mxu0 %v1153_v2  ;;  %v412_v25 = vpack.c.bf16 %v397_v23, %v396_v22  ;;  %vm368_vm4 = vcmp.gt.f32.partialorder %v352_v34, 0.0  ;;  %v384_v42 = vmul.f32 0.1, %v352_v34  ;;  %vm369_vm5 = vcmp.gt.f32.partialorder %v353_v36, 0.0  ;;  %v1162_v48 = vld [vmem:[#allocation7 + $0x18] sm:$0xff]   ;;  %v1641_v60 = vld [vmem:[%s1548_s12 + $0x68] sm:$0xff] }
  0x75   : > { %1020 = vmatprep.subr.bf16.mxu0 %v1154_v3  ;;  %v385_v45 = vmul.f32 0.1, %v353_v36  ;;  %v333_v46 = vmul.f32 %v1567_v6, %v1611_v37  ;;  %v334_v47 = vmul.f32 %v1567_v6, %v1614_v38  ;;  %v354_v49 = vadd.f32 %v1576_v9, %v331_v41  ;;  %v1635_v58 = vld [vmem:[%s1548_s12 + $0x58] sm:$0xff]  ;;  %v1163_v61 = vld [vmem:[#allocation7 + $0x20] sm:$0xff]   ;;  %v1657_v24 = vld [vmem:[%s1548_s12 + $0x70] sm:$0xff] }
  0x76   : > { %1030 = vmatprep.mubr.bf16.mxu0 %v412_v25  ;;  %1049 = vmatpush3.bf16.msra.mxu1 %v1160_v33  ;;  %v398_v50 = vsel %vm366_vm2, %v350_v26, %v382_v35  ;;  %v399_v51 = vsel %vm367_vm3, %v351_v30, %v383_v40  ;;  %v400_v52 = vsel %vm368_vm4, %v352_v34, %v384_v42  ;;  %v1660_v25 = vld [vmem:[%s1548_s12 + $0x78] sm:$0xff]  ;;  %s1332_s12 = smov [#allocation8]  }
  0x77   : > { %1050 = vmatprep.subr.bf16.mxu1 %v1161_v39  ;;  %v355_v53 = vadd.f32 %v1576_v9, %v332_v43  ;;  %v401_v55 = vsel %vm369_vm5, %v353_v36, %v385_v45  ;;  %v356_v56 = vadd.f32 %v1576_v9, %v333_v46  ;;  %v357_v57 = vadd.f32 %v1576_v9, %v334_v47  ;;  %s1257_s27 = sshll.u32 %s1332_s12, 4  ;;  %s1258_s27 = int_to_ptr.vmem [resolvable:$false] %s1257_s27 }
  0x78   : > { %1021 = vmatpush3.bf16.msra.mxu0 %v1154_v3  ;;  %v413_v62 = vpack.c.bf16 %v399_v51, %v398_v50  ;;  %vm370_vm6 = vcmp.gt.f32.partialorder %v354_v49, 0.0  ;;  %v386_v63 = vmul.f32 0.1, %v354_v49  ;;  %v335_v0 = vmul.f32 %v1567_v6, %v1630_v54  ;;  %v1164_v50 = vld [vmem:[#allocation7 + $0x28] sm:$0xff]   ;;  %v1165_v51 = vld [vmem:[#allocation7 + $0x30] sm:$0xff]   ;;  %s1259_s29 = scalar_lea.vmem %s1258_s27, 4096  ;;  %p1260_p7 = scmp.lt.s32.totalorder %s1728_s8, %s1258_s27 }
  0x79   : > { %1022 = vmatprep.subr.bf16.mxu0 %v1155_v14  ;;  %v414_v1 = vpack.c.bf16 %v401_v55, %v400_v52  ;;  %vm371_vm7 = vcmp.gt.f32.partialorder %v355_v53, 0.0  ;;  %v387_v2 = vmul.f32 0.1, %v355_v53  ;;  %v336_v3 = vmul.f32 %v1567_v6, %v1635_v58  ;;  %v1671_v52 = vld [vmem:[%s1780_s4] ss:$0 sm:$0xff]  ;;  %p1261_p9 = scmp.lt.s32.totalorder %s1259_s29, %s1253_s19 }
  0x7a   : > { %1051 = vmatpush3.bf16.msra.mxu1 %v1161_v39  ;;  %v388_v7 = vmul.f32 0.1, %v356_v56  ;;  %v389_v8 = vmul.f32 0.1, %v357_v57  ;;  %v337_v11 = vmul.f32 %v1567_v6, %v1638_v59  ;;  %v338_v12 = vmul.f32 %v1567_v6, %v1641_v60 }
  0x7b   : > { %1052 = vmatprep.subr.bf16.mxu1 %v1162_v48  ;;  %vm372_vm8 = vcmp.gt.f32.partialorder %v356_v56, 0.0  ;;  %vm373_vm9 = vcmp.gt.f32.partialorder %v357_v57, 0.0  ;;  %v402_v15 = vsel %vm370_vm6, %v354_v49, %v386_v63  ;;  %v403_v18 = vsel %vm371_vm7, %v355_v53, %v387_v2  ;;  %p1262_p12 = por %p1261_p9, %p1260_p7 }
  0x7c   : > { %1023 = vmatpush3.bf16.msra.mxu0 %v1155_v14  ;;  %v358_v14 = vadd.f32 %v1576_v9, %v335_v0  ;;  %v359_v19 = vadd.f32 %v1576_v9, %v336_v3  ;;  %v404_v20 = vsel %vm372_vm8, %v356_v56, %v388_v7  ;;  %v360_v22 = vadd.f32 %v1576_v9, %v337_v11 }
  0x7d   : > { %1024 = vmatprep.subr.bf16.mxu0 %v1156_v21  ;;  %v361_v23 = vadd.f32 %v1576_v9, %v338_v12  ;;  %v415_v26 = vpack.c.bf16 %v403_v18, %v402_v15  ;;  %v339_v30 = vmul.f32 %v1567_v6, %v1657_v24  ;;  %v340_v33 = vmul.f32 %v1567_v6, %v1660_v25  ;;  %p1263_p2 = pnand %p1262_p12, %p1256_p3 }
  0x7e   : > { %1053 = vmatpush3.bf16.msra.mxu1 %v1162_v48  ;;  %v390_v27 = vmul.f32 0.1, %v358_v14  ;;  %vm374_vm10 = vcmp.gt.f32.partialorder %v358_v14, 0.0  ;;  %vm375_vm11 = vcmp.gt.f32.partialorder %v359_v19, 0.0  ;;  %v392_v34 = vmul.f32 0.1, %v360_v22 }
  0x7f   : > { %1054 = vmatprep.subr.bf16.mxu1 %v1163_v61  ;;  %v393_v35 = vmul.f32 0.1, %v361_v23  ;;  %vm376_vm12 = vcmp.gt.f32.partialorder %v360_v22, 0.0  ;;  %vm377_vm13 = vcmp.gt.f32.partialorder %v361_v23, 0.0  ;;  %v362_v40 = vadd.f32 %v1576_v9, %v339_v30 }
  0x80   : > { %1025 = vmatpush3.bf16.msra.mxu0 %v1156_v21  ;;  %v405_v21 = vsel %vm373_vm9, %v357_v57, %v389_v8  ;;  %v406_v36 = vsel %vm374_vm10, %v358_v14, %v390_v27  ;;  %v363_v41 = vadd.f32 %v1576_v9, %v340_v33  ;;  %v408_v42 = vsel %vm376_vm12, %v360_v22, %v392_v34  ;;  %v1166_v9 = vld [vmem:[#allocation7 + $0x38] sm:$0xff]  }
  0x81   : > { %1026 = vmatprep.subr.bf16.mxu0 %v1157_v29  ;;  %v416_v28 = vpack.c.bf16 %v405_v21, %v404_v20  ;;  %v409_v43 = vsel %vm377_vm13, %v361_v23, %v393_v35  ;;  %v394_v46 = vmul.f32 0.1, %v362_v40  ;;  %vm378_vm14 = vcmp.gt.f32.partialorder %v362_v40, 0.0 }
  0x82   : > { %1055 = vmatpush3.bf16.msra.mxu1 %v1163_v61  ;;  %v418_v45 = vpack.c.bf16 %v409_v43, %v408_v42  ;;  %v395_v6 = vmul.f32 0.1, %v363_v41  ;;  %vm379_vm15 = vcmp.gt.f32.partialorder %v363_v41, 0.0 }
  0x83   : > { %v410_v47 = vsel %vm378_vm14, %v362_v40, %v394_v46  ;;  %1056 = vmatprep.subr.bf16.mxu1 %v1164_v50 }
  0x84   : > { %1027 = vmatpush3.bf16.msra.mxu0 %v1157_v29  ;;  %v391_v29 = vmul.f32 0.1, %v359_v19  ;;  %v411_v48 = vsel %vm379_vm15, %v363_v41, %v395_v6 }
  0x85   : > { %1028 = vmatprep.subr.bf16.mxu0 %v1158_v44  ;;  %v419_v49 = vpack.c.bf16 %v411_v48, %v410_v47 }
  0x86   : > { %v407_v39 = vsel %vm375_vm11, %v359_v19, %v391_v29  ;;  %1057 = vmatpush3.bf16.msra.mxu1 %v1164_v50 }
  0x87   : > { %1058 = vmatprep.subr.bf16.mxu1 %v1165_v51 }
  0x88   : > { %1029 = vmatpush3.bf16.msra.mxu0 %v1158_v44  ;;  %v417_v44 = vpack.c.bf16 %v407_v39, %v406_v36 }
  0x8a   : > { %1059 = vmatpush3.bf16.msra.mxu1 %v1165_v51 }
  0x8b   : > { %1031 = vmatmul.mubr.bf16.vlgmr.msra.gmra.mrb[0].mxu0 %v413_v62  ;;  %1060 = vmatprep.subr.bf16.mxu1 %v1166_v9 }
  0x8c   : > { %1034 = vmatprep.mubr.bf16.mxu0 %v414_v1 }
  0x8e   : > { %1061 = vmatpush3.bf16.msra.mxu1 %v1166_v9 }
  0x93   : > { %1035 = vmatmul.mubr.bf16.gmra.mrb[4].mxu0 %v415_v26 }
  0x94   : > { %1038 = vmatprep.mubr.bf16.mxu0 %v416_v28 }
  0x9b   : > { %1039 = vmatmul.mubr.bf16.gmra.mrb[8].mxu0 %v417_v44 }
  0x9c   : > { %1042 = vmatprep.mubr.bf16.mxu0 %v418_v45 }
  0xa3   : > { %1043 = vmatmul.mubr.bf16.gmra.mrb[12].mxu0 %v419_v49 }
 0x15e   : > { %v1032_v53 = vpop.f32.mrb[0].mxu0 }
 0x15f   : > { %v534_v55 = vadd.f32 %v1032_v53, %v1671_v52  ;;  %v525_v56 = vpop.f32.mrb[1].mxu0 }
 0x160   : > { %v526_v57 = vadd.f32 %v1671_v52, %v525_v56  ;;  %v1033_v61 = vpop.f32.mrb[2].mxu0 }
 0x161   : > { %v606_v62 = vmul.f32 0.1, %v534_v55  ;;  %v537_v63 = vadd.f32 %v1033_v61, %v1671_v52  ;;  %v528_v0 = vpop.f32.mrb[3].mxu0  ;;  %vm590_vm0 = vcmp.gt.f32.partialorder %v534_v55, 0.0 }
 0x162   : > { %v604_v1 = vmul.f32 0.1, %v526_v57  ;;  %v529_v2 = vadd.f32 %v1671_v52, %v528_v0  ;;  %vm588_vm2 = vcmp.gt.f32.partialorder %v526_v57, 0.0 }
 0x163   : > { %vm591_vm1 = vcmp.gt.f32.partialorder %v537_v63, 0.0  ;;  %v607_v3 = vmul.f32 0.1, %v537_v63  ;;  %v622_v8 = vsel %vm590_vm0, %v534_v55, %v606_v62 }
 0x164   : > { %v605_v7 = vmul.f32 0.1, %v529_v2  ;;  %vm589_vm3 = vcmp.gt.f32.partialorder %v529_v2, 0.0  ;;  %v620_v14 = vsel %vm588_vm2, %v526_v57, %v604_v1 }
 0x165   : > { %v623_v11 = vsel %vm591_vm1, %v537_v63, %v607_v3 }
 0x166   : > { %v1036_v12 = vpop.f32.mrb[4].mxu0  ;;  %v621_v15 = vsel %vm589_vm3, %v529_v2, %v605_v7  ;;  %v637_v18 = vpack.c.bf16 %v623_v11, %v622_v8 }
 0x167   : > { %v550_v19 = vadd.f32 %v1036_v12, %v1671_v52  ;;  %v541_v20 = vpop.f32.mrb[5].mxu0  ;;  %v636_v21 = vpack.c.bf16 %v621_v15, %v620_v14 }
 0x168   : > { %v542_v22 = vadd.f32 %v1671_v52, %v541_v20  ;;  %v1037_v23 = vpop.f32.mrb[6].mxu0 }
 0x169   : > { %v610_v26 = vmul.f32 0.1, %v550_v19  ;;  %v553_v27 = vadd.f32 %v1037_v23, %v1671_v52  ;;  %v544_v28 = vpop.f32.mrb[7].mxu0  ;;  %1062 = vmatprep.mubr.bf16.mxu1 %v636_v21  ;;  %vm594_vm4 = vcmp.gt.f32.partialorder %v550_v19, 0.0 }
 0x16a   : > { %v608_v29 = vmul.f32 0.1, %v542_v22  ;;  %v545_v30 = vadd.f32 %v1671_v52, %v544_v28  ;;  %1063 = vmatmul.mubr.bf16.vlgmr.msra.gmra.mrb[0].mxu1 %v637_v18  ;;  %vm592_vm5 = vcmp.gt.f32.partialorder %v542_v22, 0.0 }
 0x16b   : > { %vm595_vm6 = vcmp.gt.f32.partialorder %v553_v27, 0.0  ;;  %v611_v33 = vmul.f32 0.1, %v553_v27  ;;  %v626_v35 = vsel %vm594_vm4, %v550_v19, %v610_v26 }
 0x16c   : > { %vm593_vm7 = vcmp.gt.f32.partialorder %v545_v30, 0.0  ;;  %v609_v34 = vmul.f32 0.1, %v545_v30  ;;  %v624_v40 = vsel %vm592_vm5, %v542_v22, %v608_v29 }
 0x16d   : > { %v627_v36 = vsel %vm595_vm6, %v553_v27, %v611_v33 }
 0x16e   : > { %v1040_v39 = vpop.f32.mrb[8].mxu0  ;;  %v625_v41 = vsel %vm593_vm7, %v545_v30, %v609_v34  ;;  %v639_v42 = vpack.c.bf16 %v627_v36, %v626_v35 }
 0x16f   : > { %v566_v43 = vadd.f32 %v1040_v39, %v1671_v52  ;;  %v557_v44 = vpop.f32.mrb[9].mxu0  ;;  %v638_v45 = vpack.c.bf16 %v625_v41, %v624_v40 }
 0x170   : > { %v558_v46 = vadd.f32 %v1671_v52, %v557_v44  ;;  %v1041_v6 = vpop.f32.mrb[10].mxu0 }
 0x171   : > { %v614_v47 = vmul.f32 0.1, %v566_v43  ;;  %v569_v48 = vadd.f32 %v1041_v6, %v1671_v52  ;;  %v560_v49 = vpop.f32.mrb[11].mxu0  ;;  %1066 = vmatprep.mubr.bf16.mxu1 %v638_v45  ;;  %vm598_vm8 = vcmp.gt.f32.partialorder %v566_v43, 0.0 }
 0x172   : > { %v612_v50 = vmul.f32 0.1, %v558_v46  ;;  %v561_v51 = vadd.f32 %v1671_v52, %v560_v49  ;;  %1067 = vmatmul.mubr.bf16.gmra.mrb[4].mxu1 %v639_v42  ;;  %vm596_vm9 = vcmp.gt.f32.partialorder %v558_v46, 0.0 }
 0x173   : > { %vm599_vm10 = vcmp.gt.f32.partialorder %v569_v48, 0.0  ;;  %v615_v9 = vmul.f32 0.1, %v569_v48  ;;  %v630_v55 = vsel %vm598_vm8, %v566_v43, %v614_v47 }
 0x174   : > { %vm597_vm11 = vcmp.gt.f32.partialorder %v561_v51, 0.0  ;;  %v613_v53 = vmul.f32 0.1, %v561_v51  ;;  %v628_v61 = vsel %vm596_vm9, %v558_v46, %v612_v50 }
 0x175   : > { %v631_v56 = vsel %vm599_vm10, %v569_v48, %v615_v9 }
 0x176   : > { %v1044_v57 = vpop.f32.mrb[12].mxu0  ;;  %v629_v62 = vsel %vm597_vm11, %v561_v51, %v613_v53  ;;  %v641_v63 = vpack.c.bf16 %v631_v56, %v630_v55 }
 0x177   : > { %v582_v0 = vadd.f32 %v1044_v57, %v1671_v52  ;;  %v573_v1 = vpop.f32.mrb[13].mxu0  ;;  %v640_v2 = vpack.c.bf16 %v629_v62, %v628_v61 }
 0x178   : > { %v574_v3 = vadd.f32 %v1671_v52, %v573_v1  ;;  %v1045_v7 = vpop.f32.mrb[14].mxu0 }
 0x179   : > { %v618_v8 = vmul.f32 0.1, %v582_v0  ;;  %v585_v11 = vadd.f32 %v1045_v7, %v1671_v52  ;;  %v576_v12 = vpop.f32.mrb[15].mxu0  ;;  %1070 = vmatprep.mubr.bf16.mxu1 %v640_v2  ;;  %vm602_vm12 = vcmp.gt.f32.partialorder %v582_v0, 0.0 }
 0x17a   : > { %v616_v14 = vmul.f32 0.1, %v574_v3  ;;  %v577_v15 = vadd.f32 %v1671_v52, %v576_v12  ;;  %1071 = vmatmul.mubr.bf16.gmra.mrb[8].mxu1 %v641_v63  ;;  %vm600_vm13 = vcmp.gt.f32.partialorder %v574_v3, 0.0 }
 0x17b   : > { %vm603_vm14 = vcmp.gt.f32.partialorder %v585_v11, 0.0  ;;  %v619_v18 = vmul.f32 0.1, %v585_v11  ;;  %v634_v20 = vsel %vm602_vm12, %v582_v0, %v618_v8 }
 0x17c   : > { %vm601_vm15 = vcmp.gt.f32.partialorder %v577_v15, 0.0  ;;  %v617_v19 = vmul.f32 0.1, %v577_v15  ;;  %v632_v22 = vsel %vm600_vm13, %v574_v3, %v616_v14 }
 0x17d   : > { %v635_v21 = vsel %vm603_vm14, %v585_v11, %v619_v18 }
 0x17e   : > { %v633_v23 = vsel %vm601_vm15, %v577_v15, %v617_v19  ;;  %v643_v26 = vpack.c.bf16 %v635_v21, %v634_v20 }
 0x17f   : > { %v642_v27 = vpack.c.bf16 %v633_v23, %v632_v22 }
 0x181   : > { %1074 = vmatprep.mubr.bf16.mxu1 %v642_v27 }
 0x182   : > { %1075 = vmatmul.mubr.bf16.gmra.mrb[12].mxu1 %v643_v26 }
 0x23d   : > { %v1064_v28 = vpop.f32.mrb[0].mxu1 }
 0x23e   : > { %v807_v29 = vadd.f32 %v1064_v28, %v1579_v10  ;;  %v742_v30 = vpop.f32.mrb[1].mxu1 }
 0x23f   : > { %v805_v52 = vadd.f32 %v742_v30, %v1559_v4  ;;  %v1065_v33 = vpop.f32.mrb[2].mxu1 }
 0x240   : > { %823 = vst [vmem:[%s1693_s20 + $0x10] sm:$0xff] %v807_v29  ;;  %v808_v34 = vadd.f32 %v1065_v33, %v1584_v13  ;;  %v745_v35 = vpop.f32.mrb[3].mxu1 }
 0x241   : > { %821 = vst [vmem:[%s1693_s20] sm:$0xff] %v805_v52  ;;  %v806_v10 = vadd.f32 %v745_v35, %v1562_v5 }
 0x242   : > { %824 = vst [vmem:[%s1693_s20 + $0x18] sm:$0xff] %v808_v34 }
 0x243   : > { %822 = vst [vmem:[%s1693_s20 + $0x8] sm:$0xff] %v806_v10 }
 0x245   : > { %v1068_v4 = vpop.f32.mrb[4].mxu1 }
 0x246   : > { %v811_v36 = vadd.f32 %v1068_v4, %v1603_v31  ;;  %v758_v39 = vpop.f32.mrb[5].mxu1 }
 0x247   : > { %v809_v40 = vadd.f32 %v758_v39, %v1589_v16  ;;  %v1069_v41 = vpop.f32.mrb[6].mxu1 }
 0x248   : > { %827 = vst [vmem:[%s1693_s20 + $0x30] sm:$0xff] %v811_v36  ;;  %v812_v13 = vadd.f32 %v1069_v41, %v1606_v32  ;;  %v761_v42 = vpop.f32.mrb[7].mxu1 }
 0x249   : > { %825 = vst [vmem:[%s1693_s20 + $0x20] sm:$0xff] %v809_v40  ;;  %v810_v5 = vadd.f32 %v761_v42, %v1592_v17 }
 0x24a   : > { %828 = vst [vmem:[%s1693_s20 + $0x38] sm:$0xff] %v812_v13 }
 0x24b   : > { %826 = vst [vmem:[%s1693_s20 + $0x28] sm:$0xff] %v810_v5 }
 0x24d   : > { %v1072_v31 = vpop.f32.mrb[8].mxu1 }
 0x24e   : > { %v815_v43 = vadd.f32 %v1072_v31, %v1630_v54  ;;  %v774_v44 = vpop.f32.mrb[9].mxu1 }
 0x24f   : > { %v813_v16 = vadd.f32 %v774_v44, %v1611_v37  ;;  %v1073_v45 = vpop.f32.mrb[10].mxu1 }
 0x250   : > { %831 = vst [vmem:[%s1693_s20 + $0x50] sm:$0xff] %v815_v43  ;;  %v816_v32 = vadd.f32 %v1073_v45, %v1635_v58  ;;  %v777_v46 = vpop.f32.mrb[11].mxu1 }
 0x251   : > { %829 = vst [vmem:[%s1693_s20 + $0x40] sm:$0xff] %v813_v16  ;;  %v814_v17 = vadd.f32 %v777_v46, %v1614_v38 }
 0x252   : > { %832 = vst [vmem:[%s1693_s20 + $0x58] sm:$0xff] %v816_v32 }
 0x253   : > { %830 = vst [vmem:[%s1693_s20 + $0x48] sm:$0xff] %v814_v17 }
 0x255   : > { %v1076_v6 = vpop.f32.mrb[12].mxu1 }
 0x256   : > { %v819_v37 = vadd.f32 %v1076_v6, %v1657_v24  ;;  %v790_v54 = vpop.f32.mrb[13].mxu1 }
 0x257   : > { %v817_v47 = vadd.f32 %v790_v54, %v1638_v59  ;;  %v1077_v58 = vpop.f32.mrb[14].mxu1 }
 0x258   : > { %835 = vst [vmem:[%s1693_s20 + $0x70] sm:$0xff] %v819_v37  ;;  %v820_v48 = vadd.f32 %v1077_v58, %v1660_v25  ;;  %v793_v49 = vpop.f32.mrb[15].mxu1 }
 0x259   : > { %833 = vst [vmem:[%s1693_s20 + $0x60] sm:$0xff] %v817_v47  ;;  %v818_v38 = vadd.f32 %v793_v49, %v1641_v60 }
 0x25a   : > { %836 = vst [vmem:[%s1693_s20 + $0x78] sm:$0xff] %v820_v48 }
 0x25b   : > { %834 = vst [vmem:[%s1693_s20 + $0x68] sm:$0xff] %v818_v38 }
 0x25c   : > { %1266 = shalt.err (!%p1263_p2)
}
 0x25d   : > { %s1267_s14 = scalar_lea.hbm %s1726_s10, 2048  ;;  %s1271_s17 = scalar_lea.hbm %s1782_s6, 4096 }
 0x25e   : > { %p1268_p13 = scmp.ne.s32.totalorder %s1726_s10, %s1267_s14  ;;  %p1272_p4 = scmp.lt.u32.totalorder %s1726_s10, %s1782_s6 }
 0x25f   : > { %p1273_p5 = scmp.lt.u32.totalorder %s1271_s17, %s1267_s14  ;;  %p1275_p11 = scmp.lt.u32.totalorder %s1267_s14, %s1726_s10 }
 0x260   : > { %p1269_p6 = pnand %p1268_p13, %p1796_p0 }
 0x261   : > { %p1274_p8 = por %p1273_p5, %p1272_p4 }
 0x262   : > { %p1270_p10 = pneg %p1269_p6 }
 0x263   : > { %p1276_p1 = por %p1275_p11, %p1274_p8 }
 0x265   : > { %p1277_p3 = pnand %p1276_p1, %p1270_p10 }
 0x267   : > { %1280 = shalt.err (!%p1277_p3)
}
 0x268   : > { %s1333_s18 = smov 128   ;;  %s1334_s30 = smov 8  }
 0x269   : > { %1088 = dma.vmem_to_hbm [thread:$0]  (%p1796_p0), %s1728_s8, 2048, %s1726_s10, %s838_s25, %s1333_s18, %s1333_s18, %s1334_s30  }
 0x26a PF: > { %s866_s19 = sand.u32 1, %s1311_s21   ;;  %p1797_p7 = scmp.ne.s32.totalorder %s1787_s28, 0 }
 0x26b   : > { %p1798_p9 = scmp.ge.s32.totalorder %s1323_s24, 2  ;;  %s867_s12 = scalar_lea.sflag [#allocation4], %s866_s19 }
 0x26d   : > { %p1102_p12 = pnand %p1798_p9, %p1797_p7 }
 0x26f   : > { %1306 = dma.done.wait (!%p1102_p12), %s867_s12, 2048  }
 0x270   : > { %1308 = vsyncadd (!%p1102_p12), %s867_s12, 4294965248  ;;  %p20_p2 = scmp.ge.s32.totalorder %s1480_s26, 4   ;;  %s1799_s21 = smov %s1315_s22 }
 0x271   : > { %s1800_s22 = smov %s1319_s23  ;;  %s1801_s23 = smov %s1496_s11 }
 0x272   : > { %s1802_s24 = smov %s1480_s26  ;;  %22 = sbr.rel (!%p20_p2) target bundleno = 6 (0x6), region = 97 }
 0x279   :  { %872 = vsyncpa [#allocation3], 1 }
 0x27a   :  { %874 = vsyncpa [#allocation3 + $0x1], 1 }
 0x27b   :  { %875 = vsyncpa [#allocation6], 1 }
 0x27c   :  { %876 = vsyncpa [#allocation4], 1 }
 0x27d   :  { %878 = vsyncpa [#allocation4 + $0x1], 1 }

</bundles_post_ra>
